<compile_context>
chip_gen: v7x
topology: tpu7x:2x2x1
jax: 0.10.0
libtpu: 0.0.40
codegen_flags: <defaults>
</compile_context>

<pallas_src>
import math

import jax
import jax.numpy as jnp
from jax.experimental import pallas as pl
from jax.experimental.pallas import tpu as pltpu


_TARGET_BLOCK_BYTES = 2 * 1024 * 1024  # ~2 MiB blocks: near-roofline, v7x-safe


def _drop_path_kernel(scale_ref, x_ref, o_ref):
    """Scale a (TB, TF) tile by a per-sample (TB, 1) factor.

    scale_ref: (TB, 1) float32, each value is 0.0 or 1/keep_prob.
    x_ref / o_ref: (TB, TF) lane-dense tile of the flattened (B, F) input.
    Multiply is done in f32 (scale stays f32), matching x.div(keep_prob)
    precision even for bf16 inputs; only the final result is cast back.
    """
    x = x_ref[...].astype(jnp.float32)
    o_ref[...] = (x * scale_ref[...]).astype(o_ref.dtype)


def _choose_tiles(B, F, itemsize, target_bytes=_TARGET_BLOCK_BYTES):
    """Pick (TB, TF) so each block is ~target_bytes and satisfies the (8, 128)
    tiling rule: each of the last two block dims is either a multiple of the
    native tile or spans the full array dim."""
    if B * F * itemsize <= target_bytes:
        return B, F  # whole array in a single block
    row_bytes = F * itemsize
    min_tb = B if B <= 8 else 8
    if row_bytes * min_tb > target_bytes:
        # Even the minimal sublane-aligned batch tile blows the budget:
        # keep the batch tile minimal and tile the flattened feature dim.
        TB = min_tb
        tf = max(1, target_bytes // (TB * itemsize))
        TF = F if tf >= F else max(128, (tf // 128) * 128)
    else:
        # A full flattened sample fits: coarsen over the batch dim instead.
        TF = F
        tb = max(1, target_bytes // row_bytes)
        TB = B if tb >= B else max(8, (tb // 8) * 8)
    return TB, TF


def drop_path(x, drop_prob, key, training=True):
    """Functional equivalent of DropPath.forward (stochastic depth per sample)."""
    # NOTE: drop_prob / training must be static Python values (mirrors the
    # PyTorch early return; a traced drop_prob would silently bypass this).
    if drop_prob == 0.0 or not training:
        return x
    keep_prob = 1.0 - drop_prob
    B = x.shape[0]
    F = math.prod(x.shape[1:]) if x.ndim > 1 else 1

    # One uniform per sample (torch.rand of shape (B, 1, ..., 1)); the per-sample
    # scale is 0 or 1/keep_prob, computed in f32 and fed as a (B, 1) tensor.
    rand = jax.random.uniform(key, (B,), dtype=jnp.float32)
    scale = (jnp.floor(keep_prob + rand) / keep_prob).reshape(B, 1)

    # Flatten trailing dims -> lane-dense last dim (wide, unmasked stores).
    x2 = x.reshape(B, F)

    itemsize = jnp.dtype(x.dtype).itemsize
    TB, TF = _choose_tiles(B, F, itemsize)
    grid = (pl.cdiv(B, TB), pl.cdiv(F, TF))

    # TODO(synk): optionally skip the HBM read of fully-dropped samples via a
    # data-dependent index_map (saves ~drop_prob x read bandwidth for large B).
    out2 = pl.pallas_call(
        _drop_path_kernel,
        out_shape=jax.ShapeDtypeStruct((B, F), x.dtype),
        grid=grid,
        in_specs=[
            pl.BlockSpec((TB, 1), lambda b, f: (b, 0)),    # per-sample scale
            pl.BlockSpec((TB, TF), lambda b, f: (b, f)),   # input tile
        ],
        out_specs=pl.BlockSpec((TB, TF), lambda b, f: (b, f)),
        compiler_params=pltpu.CompilerParams(
            dimension_semantics=("parallel", "parallel"),
            vmem_limit_bytes=32 * 1024 * 1024,
        ),
    )(scale, x2)
    return out2.reshape(x.shape)


if __name__ == "__main__":
    key = jax.random.PRNGKey(0)
    k_x, k_drop = jax.random.split(key)

    B, L, D = 2, 8, 32
    drop_prob = 0.3
    x = jax.random.normal(k_x, (B, L, D), dtype=jnp.float32)

    # Training-mode forward (the only branch with real compute).
    out = jax.block_until_ready(drop_path(x, drop_prob, k_drop, training=True))

    # Pure-JAX reference of the PyTorch semantics, same RNG draw.
    keep_prob = 1.0 - drop_prob
    rand = jax.random.uniform(k_drop, (B,), dtype=jnp.float32)
    mask = jnp.floor(keep_prob + rand).reshape((B,) + (1,) * (x.ndim - 1))
    ref = (x / keep_prob) * mask
    assert out.shape == x.shape and out.dtype == x.dtype
    assert jnp.allclose(out, ref, atol=1e-6, rtol=1e-6), "mismatch vs reference"

    # Eval / drop_prob==0 path is identity (matches the PyTorch early return).
    out_eval = jax.block_until_ready(drop_path(x, drop_prob, k_drop, training=False))
    assert jnp.array_equal(out_eval, x)
    assert jnp.array_equal(jax.block_until_ready(drop_path(x, 0.0, k_drop, True)), x)

    print("KERNEL_OK")
</pallas_src>

<mosaic_0001>
module attributes {stable_mosaic.version = 11 : i64} {
  func.func @_drop_path_kernel(%arg0: i32, %arg1: i32, %arg2: memref<2x1xf32, #tpu.memory_space<vmem>>, %arg3: memref<2x256xf32, #tpu.memory_space<vmem>>, %arg4: memref<2x256xf32, #tpu.memory_space<vmem>>) attributes {dimension_semantics = [#tpu.dimension_semantics<parallel>, #tpu.dimension_semantics<parallel>], iteration_bounds = array<i64: 1, 1>, scalar_prefetch = 0 : i64, scratch_operands = 0 : i64, tpu.core_type = #tpu.core_type<tc>, window_params = [{transform_indices = @transform_0, window_bounds = array<i64: 2, 1>}, {transform_indices = @transform_1, window_bounds = array<i64: 2, 256>}, {transform_indices = @transform_2, window_bounds = array<i64: 2, 256>}]} {
    %c0 = arith.constant 0 : index
    %c0_0 = arith.constant 0 : index
    %0 = vector.load %arg3[%c0, %c0_0] : memref<2x256xf32, #tpu.memory_space<vmem>>, vector<2x256xf32>
    %c0_1 = arith.constant 0 : index
    %c0_2 = arith.constant 0 : index
    %1 = vector.load %arg2[%c0_1, %c0_2] : memref<2x1xf32, #tpu.memory_space<vmem>>, vector<2x1xf32>
    %2 = vector.broadcast %1 : vector<2x1xf32> to vector<2x256xf32>
    %3 = arith.mulf %0, %2 : vector<2x256xf32>
    %c0_3 = arith.constant 0 : index
    %c0_4 = arith.constant 0 : index
    %4 = vector.load %arg4[%c0_3, %c0_4] : memref<2x256xf32, #tpu.memory_space<vmem>>, vector<2x256xf32>
    tpu.vector_store %arg4[%c0_3, %c0_4], %3 {strides = array<i32>} : memref<2x256xf32, #tpu.memory_space<vmem>>, vector<2x256xf32>,
    return
  }
  func.func @transform_0(%arg0: i32, %arg1: i32) -> (i32, i32) {
    %c0_i32 = arith.constant 0 : i32
    %c0_i32_0 = arith.constant 0 : i32
    return %arg0, %c0_i32 : i32, i32
  }
  func.func @transform_1(%arg0: i32, %arg1: i32) -> (i32, i32) {
    %c0_i32 = arith.constant 0 : i32
    return %arg0, %arg1 : i32, i32
  }
  func.func @transform_2(%arg0: i32, %arg1: i32) -> (i32, i32) {
    %c0_i32 = arith.constant 0 : i32
    return %arg0, %arg1 : i32, i32
  }
}

</mosaic_0001>

<bundles_post_ra>
// kernel: tpu_custom_call.1
= control target key start
LH: loop header
LB: loop body
LE: loop exit
PB: predicated region body
PF: predicated region fallthrough
CT: control target
= control target key end

     0   :  { %v70_v1 = vmov 0   ;;  %s106_s0 = inlined_call_operand.vmem [shape: f32[2,1], index: 0, kind: input, shape index: {}]   ;;  %s107_s1 = inlined_call_operand.vmem [shape: f32[2,256], index: 1, kind: input, shape index: {}]   ;;  %s108_s2 = inlined_call_operand.hbm [shape: f32[2,256], index: 2, kind: output, shape index: {}]  }
   0x1   :  { %v13_v0 = vld [vmem:[%s106_s0] sm:$0x3]  ;;  %45 = vset.pattern.permute.xlu0 %v70_v1 }
   0x2   :  { %7 = vsyncpa [#allocation3], 0  ;;  %16 = vperm.xlu0 %45, %v13_v0   ;;  %v71_v2 = vmov 269488144   ;;  %v21_v4 = vlaneseq  ;;  %v12_v9 = vld [vmem:[%s107_s1] sm:$0xf] }
   0x3   :  { %v19_v3 = vunpack.c.l.s4 %v71_v2  ;;  %s72_s13 = smov [#allocation2]  }
   0x4   :  { %v22_v6 = vshrl.u32 %v21_v4, 7  ;;  %s34_s14 = sshll.u32 %s72_s13, 4  ;;  %s35_s14 = int_to_ptr.vmem [resolvable:$true] %s34_s14 }
   0x5   :  { %v20_v5 = vunpack.c.0.s8 %v19_v3  ;;  %s46_s0 = scalar_lea.vmem %s35_s14, 64  ;;  %p51_p1 = scmp.lt.s32.totalorder %s35_s14, %s35_s14 }
   0x6   :  { %p47_p0 = scmp.ne.s32.totalorder %s35_s14, %s46_s0  ;;  %p52_p2 = scmp.lt.s32.totalorder %s46_s0, %s46_s0 }
   0x7   :  { %v23_v7 = vsub.s32 %v20_v5, %v22_v6 }
   0x8   :  { %p53_p3 = por %p52_p2, %p51_p1 }
   0xa   :  { %p54_p4 = pnand %p53_p3, %p47_p0 }
  0x81   :  { %v17_v8 = vpop.permute.xlu0 %16 }
  0x82   :  { %v24_v10 = vrot.slane %v17_v8, %v23_v7 }
  0x84   :  { %v26_v11 = vmul.f32 %v24_v10, %v12_v9 }
  0x86   :  { %27 = vst [vmem:[#allocation2] sm:$0xf] %v26_v11 }
  0x87   :  { %57 = shalt.err (!%p54_p4)
}
  0x88   :  { %s58_s17 = scalar_lea.hbm %s108_s2, 64 }
  0x89   :  { %p59_p5 = scmp.ne.s32.totalorder %s108_s2, %s58_s17  ;;  %p62_p6 = scmp.lt.u32.totalorder %s58_s17, %s108_s2 }
  0x8b   :  { %p64_p7 = pnand %p62_p6, %p59_p5 }
  0x8d   :  { %67 = shalt.err (!%p64_p7)
}
  0x8e   :  { %37 = dma.vmem_to_hbm [thread:$0]  %s35_s14, 64, %s108_s2, [#allocation3]  }
  0x8f   :  { %68 = dma.done.wait [#allocation3], 64  }
  0x90   :  { %69 = vsyncadd [#allocation3], 4294967232 }
  0x91   :  { %41 = vsyncpa [#allocation3], 1 }

</bundles_post_ra>
